<compile_context>
chip_gen: v5e
topology: v5e:2x2
jax: 0.10.0
libtpu: 0.0.40
codegen_flags: <defaults>
</compile_context>

<pallas_src>
import functools

import jax
import jax.numpy as jnp
from jax.experimental import pallas as pl
from jax.experimental.pallas import tpu as pltpu

EMB_DIM = 288
HIDDEN = 256


def _round_up(x, m):
    return (x + m - 1) // m * m


def _fdnet_kernel(x_ref, act_ref, w1e_ref, w1a_ref, b1_ref, w2_ref, b2_ref,
                  o_ref):
    # x_ref:   (TM, 288)   f32      act_ref: (TM, 1)      int32
    # w1e_ref: (288, 256)  bf16     w1a_ref: (A_PAD, 256) bf16 (zero-pad rows)
    # b1_ref:  (1, 256)    f32      w2_ref:  (256, 288)   bf16
    # b2_ref:  (1, 288)    f32      o_ref:   (TM, 288)    f32 (or bf16)
    tm = x_ref.shape[0]
    a_pad = w1a_ref.shape[0]

    # Cast activations to bf16 in-register (no extra HBM pass in the wrapper);
    # accumulate in f32 on the MXU.
    x = x_ref[...].astype(w1e_ref.dtype)
    h = jnp.dot(x, w1e_ref[...], preferred_element_type=jnp.float32)

    # Action part: build the one-hot tile in-register and hit the MXU with it.
    # NOTE: in a partial final tile the OOB rows of act hold undefined values;
    # the compare still yields a plain 0/1 vector (no OOB memory access) and
    # those output rows are never written back, so this is safe.
    act = act_ref[...]                                            # (TM, 1) i32
    lanes = jax.lax.broadcasted_iota(jnp.int32, (tm, a_pad), 1)   # (TM, A_PAD)
    onehot = (lanes == act).astype(w1a_ref.dtype)                 # bf16 one-hot
    h = h + jnp.dot(onehot, w1a_ref[...], preferred_element_type=jnp.float32)

    # bias + ReLU in f32 on the VPU.
    h = jnp.maximum(h + b1_ref[...], 0.0)

    # second Linear: bf16 operands, f32 accumulation, f32 bias.
    out = jnp.dot(h.astype(w2_ref.dtype), w2_ref[...],
                  preferred_element_type=jnp.float32) + b2_ref[...]
    o_ref[...] = out.astype(o_ref.dtype)


@functools.partial(jax.jit, static_argnames=("tm", "out_dtype"))
def forward_dynamics_pallas(x, act, w1e, w1a, b1, w2, b2, *, tm=1024,
                            out_dtype=jnp.float32):
    """x: (M, 288) f32, act: (M, 1) int32 -> (M, 288) out_dtype."""
    M = x.shape[0]
    a_pad, H = w1a.shape
    Dout = w2.shape[1]

    # Row tile: large enough to amortize the ~0.35 us per-grid-step overhead,
    # but capped so the grid has at least 2 steps (keeps both v7x TensorCores
    # busy); always a multiple of 8 (sublane alignment).
    TM = min(tm, _round_up(pl.cdiv(M, 2), 8))
    grid = (pl.cdiv(M, TM),)   # partial final block handled by Pallas masking

    out_bytes = jnp.dtype(out_dtype).itemsize
    weight_bytes = (w1e.size + w1a.size + w2.size) * 2 + (b1.size + b2.size) * 4
    cost = pl.CostEstimate(
        flops=2 * M * (EMB_DIM * H + a_pad * H + H * Dout),
        transcendentals=0,
        bytes_accessed=M * (EMB_DIM * 4 + 4 + Dout * out_bytes) + weight_bytes,
    )

    # Weights/biases use constant index_maps -> fetched once, VMEM-resident.
    # TODO(synk): optionally mark the weight specs pipeline_mode=pl.Buffered(1)
    # for a ~1 MiB VMEM saving on v7x if this kernel is fused with neighbors.
    return pl.pallas_call(
        _fdnet_kernel,
        out_shape=jax.ShapeDtypeStruct((M, Dout), out_dtype),
        grid=grid,
        in_specs=[
            pl.BlockSpec((TM, EMB_DIM), lambda i: (i, 0)),      # x   (tiled, f32)
            pl.BlockSpec((TM, 1), lambda i: (i, 0)),            # act (tiled)
            pl.BlockSpec((EMB_DIM, H), lambda i: (0, 0)),       # w1_emb (resident)
            pl.BlockSpec((a_pad, H), lambda i: (0, 0)),         # w1_act (resident)
            pl.BlockSpec((1, H), lambda i: (0, 0)),             # b1     (resident)
            pl.BlockSpec((H, Dout), lambda i: (0, 0)),          # w2     (resident)
            pl.BlockSpec((1, Dout), lambda i: (0, 0)),          # b2     (resident)
        ],
        out_specs=pl.BlockSpec((TM, Dout), lambda i: (i, 0)),
        compiler_params=pltpu.CompilerParams(
            dimension_semantics=("parallel",),
            vmem_limit_bytes=32 * 1024 * 1024,
        ),
        cost_estimate=cost,
    )(x, act, w1e, w1a, b1, w2, b2)


class MarioDoomForwardDynamicsNet:
    """JAX/Pallas re-implementation of the PyTorch module."""

    def __init__(self, num_actions, key):
        self.num_actions = num_actions
        # Action rows of W1 zero-padded to a bf16 sublane-aligned depth of 32
        # (was 128) so the in-kernel one-hot matmul has minimal dead K.
        self.a_pad = _round_up(max(num_actions, 1), 32)
        k1, k2 = jax.random.split(key, 2)
        relu_gain = jnp.sqrt(2.0)  # nn.init.calculate_gain('relu')
        ortho = jax.nn.initializers.orthogonal()
        # PyTorch Linear stores weight as (out, in); we keep (in, out) and
        # apply x @ W, equivalent to x @ weight.T in PyTorch.
        w1 = relu_gain * ortho(k1, (EMB_DIM + num_actions, HIDDEN), jnp.float32)
        self.w1_emb = w1[:EMB_DIM].astype(jnp.bfloat16)
        w1_act = jnp.zeros((self.a_pad, HIDDEN), jnp.float32)
        w1_act = w1_act.at[:num_actions].set(w1[EMB_DIM:])
        self.w1_act = w1_act.astype(jnp.bfloat16)
        self.b1 = jnp.zeros((1, HIDDEN), jnp.float32)
        self.w2 = ortho(k2, (HIDDEN, EMB_DIM), jnp.float32).astype(jnp.bfloat16)
        self.b2 = jnp.zeros((1, EMB_DIM), jnp.float32)

    def __call__(self, state_embedding, action):
        # state_embedding: (T, B, 288) float32; action: (T, B) int
        T, B, D = state_embedding.shape
        assert D == EMB_DIM
        M = T * B
        # Pass f32 straight through (reshape is free); bf16 cast happens
        # inside the kernel, so no extra HBM read+write pass over x.
        x = state_embedding.reshape(M, EMB_DIM)
        act = action.reshape(M, 1).astype(jnp.int32)
        out = forward_dynamics_pallas(x, act, self.w1_emb, self.w1_act,
                                      self.b1, self.w2, self.b2)
        return out.reshape(T, B, EMB_DIM)


def _reference(model, state_embedding, action):
    """Pure-JAX reference (same bf16 operand rounding as the kernel)."""
    x = state_embedding.astype(jnp.bfloat16).astype(jnp.float32)
    w1e = model.w1_emb.astype(jnp.float32)
    w1a = model.w1_act.astype(jnp.float32)[: model.num_actions]
    w2 = model.w2.astype(jnp.float32)
    a = jax.nn.one_hot(action, model.num_actions, dtype=jnp.float32)
    h = x @ w1e + a @ w1a + model.b1[0]
    h = jnp.maximum(h, 0.0).astype(jnp.bfloat16).astype(jnp.float32)
    return h @ w2 + model.b2[0]


if __name__ == "__main__":
    key = jax.random.PRNGKey(0)
    k_param, k_state, k_act = jax.random.split(key, 3)

    num_actions = 7
    T, B = 2, 4  # small unroll-length x batch

    model = MarioDoomForwardDynamicsNet(num_actions, k_param)

    state_embedding = jax.random.normal(k_state, (T, B, EMB_DIM), jnp.float32)
    action = jax.random.randint(k_act, (T, B), 0, num_actions, jnp.int32)

    out = model(state_embedding, action)
    out = jax.block_until_ready(out)

    ref = _reference(model, state_embedding, action)
    assert out.shape == (T, B, EMB_DIM)
    assert jnp.allclose(out, ref, atol=2e-3, rtol=2e-3), "mismatch vs reference"

    print("KERNEL_OK")
</pallas_src>

<mosaic_0001>
module attributes {stable_mosaic.version = 11 : i64} {
  func.func @_fdnet_kernel(%arg0: i32, %arg1: memref<8x288xf32, #tpu.memory_space<vmem>>, %arg2: memref<8x1xi32, #tpu.memory_space<vmem>>, %arg3: memref<288x256xbf16, #tpu.memory_space<vmem>>, %arg4: memref<32x256xbf16, #tpu.memory_space<vmem>>, %arg5: memref<1x256xf32, #tpu.memory_space<vmem>>, %arg6: memref<256x288xbf16, #tpu.memory_space<vmem>>, %arg7: memref<1x288xf32, #tpu.memory_space<vmem>>, %arg8: memref<8x288xf32, #tpu.memory_space<vmem>>) attributes {dimension_semantics = [#tpu.dimension_semantics<parallel>], iteration_bounds = array<i64: 1>, scalar_prefetch = 0 : i64, scratch_operands = 0 : i64, tpu.core_type = #tpu.core_type<tc>, window_params = [{transform_indices = @transform_0, window_bounds = array<i64: 8, 288>}, {transform_indices = @transform_1, window_bounds = array<i64: 8, 1>}, {pipeline_mode = #tpu.pipeline_mode<synchronous>, transform_indices = @transform_2, window_bounds = array<i64: 288, 256>}, {pipeline_mode = #tpu.pipeline_mode<synchronous>, transform_indices = @transform_3, window_bounds = array<i64: 32, 256>}, {pipeline_mode = #tpu.pipeline_mode<synchronous>, transform_indices = @transform_4, window_bounds = array<i64: 1, 256>}, {pipeline_mode = #tpu.pipeline_mode<synchronous>, transform_indices = @transform_5, window_bounds = array<i64: 256, 288>}, {pipeline_mode = #tpu.pipeline_mode<synchronous>, transform_indices = @transform_6, window_bounds = array<i64: 1, 288>}, {transform_indices = @transform_7, window_bounds = array<i64: 8, 288>}]} {
    %c0 = arith.constant 0 : index
    %c0_0 = arith.constant 0 : index
    %0 = vector.load %arg1[%c0, %c0_0] : memref<8x288xf32, #tpu.memory_space<vmem>>, vector<8x288xf32>
    %1 = arith.truncf %0 : vector<8x288xf32> to vector<8x288xbf16>
    %c0_1 = arith.constant 0 : index
    %c0_2 = arith.constant 0 : index
    %2 = vector.load %arg3[%c0_1, %c0_2] : memref<288x256xbf16, #tpu.memory_space<vmem>>, vector<288x256xbf16>
    %cst = arith.constant dense<0.000000e+00> : vector<8x256xf32>
    %3 = tpu.matmul %1, %2, %cst {dimension_numbers = #tpu.dot_dimension_numbers<[1], [0], [0], [1], [0, 0, 1, 1], [], []>} : vector<8x288xbf16>, vector<288x256xbf16>, vector<8x256xf32> -> vector<8x256xf32>
    %c0_3 = arith.constant 0 : index
    %c0_4 = arith.constant 0 : index
    %4 = vector.load %arg2[%c0_3, %c0_4] : memref<8x1xi32, #tpu.memory_space<vmem>>, vector<8x1xi32>
    %5 = tpu.iota {dimensions = array<i32: 1>} : vector<8x32xi32>
    %6 = vector.broadcast %4 : vector<8x1xi32> to vector<8x32xi32>
    %7 = arith.cmpi eq, %5, %6 : vector<8x32xi32>
    %8 = arith.extui %7 : vector<8x32xi1> to vector<8x32xi32>
    %9 = arith.sitofp %8 : vector<8x32xi32> to vector<8x32xf32>
    %10 = arith.truncf %9 : vector<8x32xf32> to vector<8x32xbf16>
    %c0_5 = arith.constant 0 : index
    %c0_6 = arith.constant 0 : index
    %11 = vector.load %arg4[%c0_5, %c0_6] : memref<32x256xbf16, #tpu.memory_space<vmem>>, vector<32x256xbf16>
    %cst_7 = arith.constant dense<0.000000e+00> : vector<8x256xf32>
    %12 = tpu.matmul %10, %11, %cst_7 {dimension_numbers = #tpu.dot_dimension_numbers<[1], [0], [0], [1], [0, 0, 1, 1], [], []>} : vector<8x32xbf16>, vector<32x256xbf16>, vector<8x256xf32> -> vector<8x256xf32>
    %13 = arith.addf %3, %12 : vector<8x256xf32>
    %c0_8 = arith.constant 0 : index
    %c0_9 = arith.constant 0 : index
    %14 = vector.load %arg5[%c0_8, %c0_9] : memref<1x256xf32, #tpu.memory_space<vmem>>, vector<1x256xf32>
    %15 = vector.broadcast %14 : vector<1x256xf32> to vector<8x256xf32>
    %16 = arith.addf %13, %15 : vector<8x256xf32>
    %cst_10 = arith.constant 0.000000e+00 : f32
    %17 = vector.broadcast %cst_10 : f32 to vector<8x256xf32>
    %18 = arith.maximumf %16, %17 : vector<8x256xf32>
    %19 = arith.truncf %18 : vector<8x256xf32> to vector<8x256xbf16>
    %c0_11 = arith.constant 0 : index
    %c0_12 = arith.constant 0 : index
    %20 = vector.load %arg6[%c0_11, %c0_12] : memref<256x288xbf16, #tpu.memory_space<vmem>>, vector<256x288xbf16>
    %cst_13 = arith.constant dense<0.000000e+00> : vector<8x288xf32>
    %21 = tpu.matmul %19, %20, %cst_13 {dimension_numbers = #tpu.dot_dimension_numbers<[1], [0], [0], [1], [0, 0, 1, 1], [], []>} : vector<8x256xbf16>, vector<256x288xbf16>, vector<8x288xf32> -> vector<8x288xf32>
    %c0_14 = arith.constant 0 : index
    %c0_15 = arith.constant 0 : index
    %22 = vector.load %arg7[%c0_14, %c0_15] : memref<1x288xf32, #tpu.memory_space<vmem>>, vector<1x288xf32>
    %23 = vector.broadcast %22 : vector<1x288xf32> to vector<8x288xf32>
    %24 = arith.addf %21, %23 : vector<8x288xf32>
    %c0_16 = arith.constant 0 : index
    %c0_17 = arith.constant 0 : index
    %25 = vector.load %arg8[%c0_16, %c0_17] : memref<8x288xf32, #tpu.memory_space<vmem>>, vector<8x288xf32>
    tpu.vector_store %arg8[%c0_16, %c0_17], %24 {strides = array<i32>} : memref<8x288xf32, #tpu.memory_space<vmem>>, vector<8x288xf32>,
    return
  }
  func.func @transform_0(%arg0: i32) -> (i32, i32) {
    %c0_i32 = arith.constant 0 : i32
    %c0_i32_0 = arith.constant 0 : i32
    return %arg0, %c0_i32 : i32, i32
  }
  func.func @transform_1(%arg0: i32) -> (i32, i32) {
    %c0_i32 = arith.constant 0 : i32
    %c0_i32_0 = arith.constant 0 : i32
    return %arg0, %c0_i32 : i32, i32
  }
  func.func @transform_2(%arg0: i32) -> (i32, i32) {
    %c0_i32 = arith.constant 0 : i32
    %c0_i32_0 = arith.constant 0 : i32
    %c0_i32_1 = arith.constant 0 : i32
    return %c0_i32, %c0_i32_0 : i32, i32
  }
  func.func @transform_3(%arg0: i32) -> (i32, i32) {
    %c0_i32 = arith.constant 0 : i32
    %c0_i32_0 = arith.constant 0 : i32
    %c0_i32_1 = arith.constant 0 : i32
    return %c0_i32, %c0_i32_0 : i32, i32
  }
  func.func @transform_4(%arg0: i32) -> (i32, i32) {
    %c0_i32 = arith.constant 0 : i32
    %c0_i32_0 = arith.constant 0 : i32
    %c0_i32_1 = arith.constant 0 : i32
    return %c0_i32, %c0_i32_0 : i32, i32
  }
  func.func @transform_5(%arg0: i32) -> (i32, i32) {
    %c0_i32 = arith.constant 0 : i32
    %c0_i32_0 = arith.constant 0 : i32
    %c0_i32_1 = arith.constant 0 : i32
    return %c0_i32, %c0_i32_0 : i32, i32
  }
  func.func @transform_6(%arg0: i32) -> (i32, i32) {
    %c0_i32 = arith.constant 0 : i32
    %c0_i32_0 = arith.constant 0 : i32
    %c0_i32_1 = arith.constant 0 : i32
    return %c0_i32, %c0_i32_0 : i32, i32
  }
  func.func @transform_7(%arg0: i32) -> (i32, i32) {
    %c0_i32 = arith.constant 0 : i32
    %c0_i32_0 = arith.constant 0 : i32
    return %arg0, %c0_i32 : i32, i32
  }
}

</mosaic_0001>

<bundles_post_ra>
// kernel: forward_dynamics_pallas.1
= control target key start
LH: loop header
LB: loop body
LE: loop exit
PB: predicated region body
PF: predicated region fallthrough
CT: control target
= control target key end

     0   :  { %v1307_v3 = vmov 0   ;;  %s1921_s0 = inlined_call_operand.vmem [shape: f32[8,288], index: 0, kind: input, shape index: {}]   ;;  %s1922_s1 = inlined_call_operand.vmem [shape: s32[8,1], index: 1, kind: input, shape index: {}]   ;;  %s1923_s2 = inlined_call_operand.vmem [shape: bf16[288,256], index: 2, kind: input, shape index: {}]   ;;  %s1924_s3 = inlined_call_operand.vmem [shape: bf16[32,256], index: 3, kind: input, shape index: {}]   ;;  %s1925_s4 = inlined_call_operand.vmem [shape: f32[1,256], index: 4, kind: input, shape index: {}]   ;;  %s1926_s5 = inlined_call_operand.vmem [shape: bf16[256,288], index: 5, kind: input, shape index: {}]   ;;  %s1927_s6 = inlined_call_operand.vmem [shape: f32[1,288], index: 6, kind: input, shape index: {}]   ;;  %s1928_s7 = inlined_call_operand.hbm [shape: f32[8,288], index: 7, kind: output, shape index: {}]  }
   0x1   :  { %v70_v0 = vld [vmem:[%s1922_s1] sm:$0xff]  ;;  %v1203_v1 = vld [vmem:[%s1923_s2 + $0x74] sm:$0xf]  ;;  %v911_v2 = vld [vmem:[%s1923_s2 + $0x78] sm:$0xf0]  ;;  %1280 = vset.pattern.permute.xlu0 %v1307_v3 }
   0x2   :  { %v914_v4 = vor.u32 %v1203_v1, %v911_v2  ;;  %v1201_v5 = vld [vmem:[%s1923_s2 + $0x64] sm:$0xf]  ;;  %v903_v6 = vld [vmem:[%s1923_s2 + $0x68] sm:$0xf0]  ;;  %v1227_v7 = vld [vmem:[%s1924_s3 + $0x14] sm:$0xf]  ;;  %74 = vperm.xlu0 %1280, %v70_v0  }
   0x3   :  { %v845_v8 = vld [vmem:[%s1924_s3 + $0x18] sm:$0xf0]  ;;  %v1199_v9 = vld [vmem:[%s1923_s2 + $0x54] sm:$0xf]  ;;  %v906_v11 = vor.u32 %v1201_v5, %v903_v6  ;;  %v1225_v13 = vld [vmem:[%s1924_s3 + $0x4] sm:$0xf] }
   0x4   :  { %v895_v10 = vld [vmem:[%s1923_s2 + $0x58] sm:$0xf0]  ;;  %356 = vmatpush.bf16.msra.mxu1 %v914_v4  ;;  %v848_v12 = vor.u32 %v1227_v7, %v845_v8  ;;  %v837_v14 = vld [vmem:[%s1924_s3 + $0x8] sm:$0xf0]  ;;  %v909_v15 = vld [vmem:[%s1923_s2 + $0x70] sm:$0xf] }
   0x5   :  { %v1204_v16 = vld [vmem:[%s1923_s2 + $0x74] sm:$0xf0]  ;;  %v973_v17 = vld [vmem:[%s1923_s2 + $0xf0] sm:$0xf]  ;;  %v840_v19 = vor.u32 %v1225_v13, %v837_v14  ;;  %v901_v22 = vld [vmem:[%s1923_s2 + $0x60] sm:$0xf]  ;;  %v898_v25 = vor.u32 %v1199_v9, %v895_v10 }
   0x6   :  { %v1220_v18 = vld [vmem:[%s1923_s2 + $0xf4] sm:$0xf0]  ;;  %127 = vmatpush.bf16.msra.mxu2 %v848_v12  ;;  %v910_v21 = vor.u32 %v1204_v16, %v909_v15  ;;  %v965_v23 = vld [vmem:[%s1923_s2 + $0xe0] sm:$0xf]  ;;  %v1218_v24 = vld [vmem:[%s1923_s2 + $0xe4] sm:$0xf0] }
   0x7   :  { %v974_v20 = vor.u32 %v1220_v18, %v973_v17  ;;  %v1202_v26 = vld [vmem:[%s1923_s2 + $0x64] sm:$0xf0]  ;;  %v966_v27 = vor.u32 %v1218_v24, %v965_v23  ;;  %v843_v28 = vld [vmem:[%s1924_s3 + $0x10] sm:$0xf]  ;;  %v1228_v29 = vld [vmem:[%s1924_s3 + $0x14] sm:$0xf0] }
   0x8   :  { %357 = vmatpush.bf16.msra.mxu1 %v906_v11  ;;  %v1197_v30 = vld [vmem:[%s1923_s2 + $0x44] sm:$0xf]  ;;  %v887_v31 = vld [vmem:[%s1923_s2 + $0x48] sm:$0xf0]  ;;  %v844_v32 = vor.u32 %v1228_v29, %v843_v28  ;;  %v957_v33 = vld [vmem:[%s1923_s2 + $0xd0] sm:$0xf]  ;;  %v902_v36 = vor.u32 %v1202_v26, %v901_v22 }
   0x9   :  { %330 = vmatpush.bf16.msra.mxu3 %v974_v20  ;;  %v1216_v34 = vld [vmem:[%s1923_s2 + $0xd4] sm:$0xf0]  ;;  %v835_v35 = vld [vmem:[%s1924_s3] sm:$0xf]  ;;  %v1226_v37 = vld [vmem:[%s1924_s3 + $0x4] sm:$0xf0] }
   0xa   :  { %128 = vmatpush.bf16.msra.mxu2 %v840_v19  ;;  %114 = vmatpush.bf16.msra.mxu0 %v844_v32 }
   0xe   :  { %317 = vmatpush.bf16.msrb.mxu2 %v910_v21 }
   0xf   :  { %12 = vsyncpa [#allocation3], 0  ;;  %358 = vmatpush.bf16.msra.mxu1 %v898_v25  ;;  %v890_v38 = vor.u32 %v1197_v30, %v887_v31  ;;  %331 = vmatpush.bf16.msra.mxu3 %v966_v27  ;;  %v893_v39 = vld [vmem:[%s1923_s2 + $0x50] sm:$0xf]  ;;  %v1200_v40 = vld [vmem:[%s1923_s2 + $0x54] sm:$0xf0]  ;;  %v958_v41 = vor.u32 %v1216_v34, %v957_v33  ;;  %v836_v42 = vor.u32 %v1226_v37, %v835_v35  ;;  %v71_v32 = vlaneseq }
  0x10   :  { %v1195_v43 = vld [vmem:[%s1923_s2 + $0x34] sm:$0xf]  ;;  %v879_v44 = vld [vmem:[%s1923_s2 + $0x38] sm:$0xf0]  ;;  %v894_v45 = vor.u32 %v1200_v40, %v893_v39  ;;  %v1193_v47 = vld [vmem:[%s1923_s2 + $0x24] sm:$0xf] }
  0x11   :  { %115 = vmatpush.bf16.msra.mxu0 %v836_v42  ;;  %v882_v46 = vor.u32 %v1195_v43, %v879_v44  ;;  %v871_v48 = vld [vmem:[%s1923_s2 + $0x28] sm:$0xf0]  ;;  %v989_v50 = vld [vmem:[%s1923_s2 + $0x110] sm:$0xf]  ;;  %v1224_v51 = vld [vmem:[%s1923_s2 + $0x114] sm:$0xf0] }
  0x12   :  { %318 = vmatpush.bf16.msrb.mxu2 %v902_v36  ;;  %v874_v49 = vor.u32 %v1193_v47, %v871_v48  ;;  %v990_v52 = vor.u32 %v1224_v51, %v989_v50  ;;  %v885_v53 = vld [vmem:[%s1923_s2 + $0x40] sm:$0xf]  ;;  %v1198_v54 = vld [vmem:[%s1923_s2 + $0x44] sm:$0xf0]  ;;  %v1191_v59 = vld [vmem:[%s1923_s2 + $0x14] sm:$0xf] }
  0x13   :  { %359 = vmatpush.bf16.msra.mxu1 %v890_v38  ;;  %332 = vmatpush.bf16.msra.mxu3 %v958_v41  ;;  %v949_v55 = vld [vmem:[%s1923_s2 + $0xc0] sm:$0xf]  ;;  %v886_v56 = vor.u32 %v1198_v54, %v885_v53  ;;  %v1214_v57 = vld [vmem:[%s1923_s2 + $0xc4] sm:$0xf0]  ;;  %v863_v60 = vld [vmem:[%s1923_s2 + $0x18] sm:$0xf0] }
  0x14   :  { %v950_v58 = vor.u32 %v1214_v57, %v949_v55  ;;  %v866_v61 = vor.u32 %v1191_v59, %v863_v60  ;;  %v981_v62 = vld [vmem:[%s1923_s2 + $0x100] sm:$0xf]  ;;  %v1222_v63 = vld [vmem:[%s1923_s2 + $0x104] sm:$0xf0]  ;;  %v877_v1 = vld [vmem:[%s1923_s2 + $0x30] sm:$0xf] }
  0x15   :  { %349 = vmatpush.bf16.msrb.mxu0 %v990_v52  ;;  %v982_v0 = vor.u32 %v1222_v63, %v981_v62  ;;  %v1196_v2 = vld [vmem:[%s1923_s2 + $0x34] sm:$0xf0]  ;;  %v941_v4 = vld [vmem:[%s1923_s2 + $0xb0] sm:$0xf]  ;;  %v1189_v7 = vld [vmem:[%s1923_s2 + $0x4] sm:$0xf] }
  0x16   :  { %319 = vmatpush.bf16.msrb.mxu2 %v894_v45  ;;  %v878_v3 = vor.u32 %v1196_v2, %v877_v1  ;;  %v1212_v5 = vld [vmem:[%s1923_s2 + $0xb4] sm:$0xf0]  ;;  %v855_v8 = vld [vmem:[%s1923_s2 + $0x8] sm:$0xf0]  ;;  %v869_v10 = vld [vmem:[%s1923_s2 + $0x20] sm:$0xf] }
  0x17   :  { %360 = vmatpush.bf16.msra.mxu1 %v882_v46  ;;  %333 = vmatpush.bf16.msra.mxu3 %v950_v58  ;;  %v942_v6 = vor.u32 %v1212_v5, %v941_v4  ;;  %v858_v9 = vor.u32 %v1189_v7, %v855_v8  ;;  %v1194_v11 = vld [vmem:[%s1923_s2 + $0x24] sm:$0xf0]  ;;  %v933_v12 = vld [vmem:[%s1923_s2 + $0xa0] sm:$0xf]  ;;  %v861_v18 = vld [vmem:[%s1923_s2 + $0x10] sm:$0xf] }
  0x18   :  { %v870_v13 = vor.u32 %v1194_v11, %v869_v10  ;;  %v1210_v14 = vld [vmem:[%s1923_s2 + $0xa4] sm:$0xf0]  ;;  %v28_v16 = vld [vmem:[%s1921_s0] sm:$0xff]  ;;  %v1192_v19 = vld [vmem:[%s1923_s2 + $0x14] sm:$0xf0]  ;;  %v72_v33 = vand.u32 127, %v71_v32 }
  0x19   :  { %350 = vmatpush.bf16.msrb.mxu0 %v982_v0  ;;  %v934_v15 = vor.u32 %v1210_v14, %v933_v12  ;;  %v1512_v17 = vpack.c.bf16 %v28_v16, %v28_v16  ;;  %v925_v20 = vld [vmem:[%s1923_s2 + $0x90] sm:$0xf]  ;;  %v862_v21 = vor.u32 %v1192_v19, %v861_v18  ;;  %v1208_v22 = vld [vmem:[%s1923_s2 + $0x94] sm:$0xf0]  ;;  %v853_v24 = vld [vmem:[%s1923_s2] sm:$0xf] }
  0x1a   :  { %320 = vmatpush.bf16.msrb.mxu2 %v886_v56  ;;  %v926_v23 = vor.u32 %v1208_v22, %v925_v20  ;;  %v1190_v25 = vld [vmem:[%s1923_s2 + $0x4] sm:$0xf0]  ;;  %v917_v26 = vld [vmem:[%s1923_s2 + $0x80] sm:$0xf]  ;;  %v1219_v34 = vld [vmem:[%s1923_s2 + $0xf4] sm:$0xf] }
  0x1b   :  { %361 = vmatpush.bf16.msra.mxu1 %v874_v49  ;;  %334 = vmatpush.bf16.msra.mxu3 %v942_v6  ;;  %v854_v27 = vor.u32 %v1190_v25, %v853_v24  ;;  %v1206_v28 = vld [vmem:[%s1923_s2 + $0x84] sm:$0xf0]  ;;  %v975_v35 = vld [vmem:[%s1923_s2 + $0xf8] sm:$0xf0]  ;;  %v1223_v36 = vld [vmem:[%s1923_s2 + $0x114] sm:$0xf] }
  0x1c   :  { %v918_v29 = vor.u32 %v1206_v28, %v917_v26  ;;  %v29_v30 = vld [vmem:[%s1921_s0 + $0x8] sm:$0xff]  ;;  %v991_v37 = vld [vmem:[%s1923_s2 + $0x118] sm:$0xf0]  ;;  %v1308_v39 = vmov 0.0   ;;  %vm104_vm1 = vcmask 261120   ;;  %v978_v41 = vor.u32 %v1219_v34, %v975_v35  ;;  %v30_v1 = vld [vmem:[%s1921_s0 + $0x10] sm:$0xff] }
  0x1d   :  { %v1542_v31 = vpack.c.bf16 %v29_v30, %v29_v30  ;;  %v1217_v42 = vld [vmem:[%s1923_s2 + $0xe4] sm:$0xf]  ;;  %v994_v43 = vor.u32 %v1223_v36, %v991_v37  ;;  %v967_v45 = vld [vmem:[%s1923_s2 + $0xe8] sm:$0xf0]  ;;  %v1083_v48 = vld [vmem:[%s1926_s5 + $0xa8] sm:$0xf]  ;;  %v33_v4 = vpack.c.bf16 %v30_v1, %v30_v1 }
  0x1e   :  { %321 = vmatpush.bf16.msrb.mxu2 %v878_v3  ;;  %v1221_v46 = vld [vmem:[%s1923_s2 + $0x104] sm:$0xf]  ;;  %v983_v47 = vld [vmem:[%s1923_s2 + $0x108] sm:$0xf0]  ;;  %v1251_v49 = vld [vmem:[%s1926_s5 + $0xb0] sm:$0xf0]  ;;  %v970_v51 = vor.u32 %v1217_v42, %v967_v45 }
  0x1f   :  { %362 = vmatpush.bf16.msra.mxu1 %v866_v61  ;;  %335 = vmatpush.bf16.msra.mxu3 %v934_v15  ;;  %v1071_v50 = vld [vmem:[%s1926_s5 + $0x90] sm:$0xf]  ;;  %v986_v52 = vor.u32 %v1221_v46, %v983_v47  ;;  %v1084_v53 = vor.u32 %v1251_v49, %v1083_v48  ;;  %v1248_v54 = vld [vmem:[%s1926_s5 + $0x98] sm:$0xf0]  ;;  %v1215_v55 = vld [vmem:[%s1923_s2 + $0xd4] sm:$0xf] }
  0x20   :  { %v959_v56 = vld [vmem:[%s1923_s2 + $0xd8] sm:$0xf0]  ;;  %v1072_v57 = vor.u32 %v1248_v54, %v1071_v50  ;;  %v1059_v58 = vld [vmem:[%s1926_s5 + $0x78] sm:$0xf]  ;;  %v1245_v59 = vld [vmem:[%s1926_s5 + $0x80] sm:$0xf0] }
  0x21   :  { %v962_v60 = vor.u32 %v1215_v55, %v959_v56  ;;  %v1213_v61 = vld [vmem:[%s1923_s2 + $0xc4] sm:$0xf]  ;;  %v951_v62 = vld [vmem:[%s1923_s2 + $0xc8] sm:$0xf0]  ;;  %v1060_v63 = vor.u32 %v1245_v59, %v1059_v58  ;;  %v1211_v2 = vld [vmem:[%s1923_s2 + $0xb4] sm:$0xf] }
  0x22   :  { %322 = vmatpush.bf16.msrb.mxu2 %v870_v13  ;;  %v954_v0 = vor.u32 %v1213_v61, %v951_v62  ;;  %v943_v3 = vld [vmem:[%s1923_s2 + $0xb8] sm:$0xf0]  ;;  %v1209_v6 = vld [vmem:[%s1923_s2 + $0xa4] sm:$0xf]  ;;  %v935_v7 = vld [vmem:[%s1923_s2 + $0xa8] sm:$0xf0] }
  0x23   :  { %363 = vmatpush.bf16.msra.mxu1 %v858_v9  ;;  %336 = vmatpush.bf16.msra.mxu3 %v926_v23  ;;  %v946_v5 = vor.u32 %v1211_v2, %v943_v3  ;;  %v938_v8 = vor.u32 %v1209_v6, %v935_v7  ;;  %v1207_v9 = vld [vmem:[%s1923_s2 + $0x94] sm:$0xf]  ;;  %v927_v10 = vld [vmem:[%s1923_s2 + $0x98] sm:$0xf0]  ;;  %v1205_v12 = vld [vmem:[%s1923_s2 + $0x84] sm:$0xf] }
  0x24   :  { %v930_v11 = vor.u32 %v1207_v9, %v927_v10  ;;  %v919_v13 = vld [vmem:[%s1923_s2 + $0x88] sm:$0xf0]  ;;  %v1047_v15 = vld [vmem:[%s1926_s5 + $0x60] sm:$0xf]  ;;  %v1275_v19 = vld [vmem:[%s1926_s5 + $0x170] sm:$0xf0] }
  0x25   :  { %v922_v14 = vor.u32 %v1205_v12, %v919_v13  ;;  %v1242_v16 = vld [vmem:[%s1926_s5 + $0x68] sm:$0xf0]  ;;  %v1035_v24 = vld [vmem:[%s1926_s5 + $0x48] sm:$0xf]  ;;  %v1239_v25 = vld [vmem:[%s1926_s5 + $0x50] sm:$0xf0] }
  0x26   :  { %364 = vmatmul.bf16.vlgmr.msra.gmra.mxu1 %v1512_v17  ;;  %323 = vmatpush.bf16.msrb.mxu2 %v862_v21  ;;  %v1048_v18 = vor.u32 %v1242_v16, %v1047_v15  ;;  %v1250_v20 = vld [vmem:[%s1926_s5 + $0xac] sm:$0xf]  ;;  %v1085_v21 = vld [vmem:[%s1926_s5 + $0xb4] sm:$0xf0]  ;;  %v1167_v26 = vld [vmem:[%s1926_s5 + $0x150] sm:$0xf] }
  0x27   :  { %337 = vmatpush.bf16.msra.mxu3 %v918_v29  ;;  %v1088_v23 = vor.u32 %v1250_v20, %v1085_v21  ;;  %v1272_v28 = vld [vmem:[%s1926_s5 + $0x158] sm:$0xf0]  ;;  %v1247_v29 = vld [vmem:[%s1926_s5 + $0x94] sm:$0xf]  ;;  %v1073_v30 = vld [vmem:[%s1926_s5 + $0x9c] sm:$0xf0] }
  0x28   :  { %v1168_v32 = vor.u32 %v1272_v28, %v1167_v26  ;;  %v1023_v34 = vld [vmem:[%s1926_s5 + $0x30] sm:$0xf]  ;;  %v1236_v35 = vld [vmem:[%s1926_s5 + $0x38] sm:$0xf0]  ;;  %v1155_v36 = vld [vmem:[%s1926_s5 + $0x138] sm:$0xf] }
  0x29   :  { %v1024_v37 = vor.u32 %v1236_v35, %v1023_v34  ;;  %v1143_v45 = vld [vmem:[%s1926_s5 + $0x120] sm:$0xf]  ;;  %v1266_v47 = vld [vmem:[%s1926_s5 + $0x128] sm:$0xf0]  ;;  %v1241_v48 = vld [vmem:[%s1926_s5 + $0x64] sm:$0xf] }
  0x2a   :  { %324 = vmatpush.bf16.msrb.mxu2 %v854_v27  ;;  %338 = vmatmul.bf16.vlgmr.msra.gmra.mxu3 %v1542_v31  ;;  %v1036_v27 = vor.u32 %v1239_v25, %v1035_v24  ;;  %v1049_v49 = vld [vmem:[%s1926_s5 + $0x6c] sm:$0xf0]  ;;  %v1144_v50 = vor.u32 %v1266_v47, %v1143_v45  ;;  %v999_v56 = vld [vmem:[%s1926_s5] sm:$0xf]  ;;  %v1131_v58 = vld [vmem:[%s1926_s5 + $0x108] sm:$0xf] }
  0x2b   :  { %735 = vmatpush.bf16.msrb.mxu3 %v1084_v53  ;;  %v1181_v53 = vld [vmem:[%s1926_s5 + $0x174] sm:$0xf0]  ;;  %v1238_v61 = vld [vmem:[%s1926_s5 + $0x4c] sm:$0xf]  ;;  %v1271_v1 = vld [vmem:[%s1926_s5 + $0x154] sm:$0xf] }
  0x2c   :  { %v1037_v62 = vld [vmem:[%s1926_s5 + $0x54] sm:$0xf0]  ;;  %v1169_v2 = vld [vmem:[%s1926_s5 + $0x15c] sm:$0xf0]  ;;  %v1091_v3 = vld [vmem:[%s1926_s5 + $0xb0] sm:$0xf] }
  0x2d   :  { %v1119_v7 = vld [vmem:[%s1926_s5 + $0xf0] sm:$0xf]  ;;  %v1235_v10 = vld [vmem:[%s1926_s5 + $0x34] sm:$0xf]  ;;  %v1268_v12 = vld [vmem:[%s1926_s5 + $0x13c] sm:$0xf] }
  0x2e   :  { %v1079_v15 = vld [vmem:[%s1926_s5 + $0x98] sm:$0xf]  ;;  %v1249_v16 = vld [vmem:[%s1926_s5 + $0xa0] sm:$0xf0]  ;;  %v1013_v24 = vld [vmem:[%s1926_s5 + $0x24] sm:$0xf0] }
  0x2f   :  { %736 = vmatpush.bf16.msrb.mxu3 %v1072_v57  ;;  %v1230_v57 = vld [vmem:[%s1926_s5 + $0x8] sm:$0xf0]  ;;  %v1107_v20 = vld [vmem:[%s1926_s5 + $0xd8] sm:$0xf]  ;;  %v1257_v21 = vld [vmem:[%s1926_s5 + $0xe0] sm:$0xf0] }
  0x30   :  { %v1000_v59 = vor.u32 %v1230_v57, %v999_v56  ;;  %v1265_v25 = vld [vmem:[%s1926_s5 + $0x124] sm:$0xf]  ;;  %v1067_v28 = vld [vmem:[%s1926_s5 + $0x80] sm:$0xf]  ;;  %v1254_v34 = vld [vmem:[%s1926_s5 + $0xc8] sm:$0xf0] }
  0x31   :  { %v1276_v47 = vld [vmem:[%s1926_s5 + $0x178] sm:$0xf0]  ;;  %v1273_v56 = vld [vmem:[%s1926_s5 + $0x160] sm:$0xf0]  ;;  %s1309_s23 = smov [#allocation2]   ;;  %s823_s26 = sshll.u32 %s1928_s7, 4  ;;  %s824_s26 = int_to_ptr.hbm [resolvable:$true] %s823_s26 }
  0x33   :  { %737 = vmatpush.bf16.msrb.mxu3 %v1060_v63 }
  0x37   :  { %738 = vmatpush.bf16.msrb.mxu3 %v1048_v18 }
  0x3b   :  { %739 = vmatpush.bf16.msrb.mxu3 %v1036_v27  ;;  %v1145_v27 = vld [vmem:[%s1926_s5 + $0x12c] sm:$0xf0] }
  0x3f   :  { %740 = vmatpush.bf16.msrb.mxu3 %v1024_v37  ;;  %v1001_v37 = vld [vmem:[%s1926_s5 + $0xc] sm:$0xf0] }
  0x74   :  { %v75_v38 = vpop.permute.xlu0 %74 }
  0x75   :  { %vm76_vm0 = vcmp.eq.s32.totalorder %v72_v33, %v75_v38  ;;  %v1076_v33 = vor.u32 %v1247_v29, %v1073_v30  ;;  %v1269_v38 = vld [vmem:[%s1926_s5 + $0x140] sm:$0xf0]  ;;  %v1148_v29 = vor.u32 %v1265_v25, %v1145_v27  ;;  %v1246_v30 = vld [vmem:[%s1926_s5 + $0x88] sm:$0xf0]  ;;  %v1115_v27 = vld [vmem:[%s1926_s5 + $0xe0] sm:$0xf] }
  0x76   :  { %v832_v40 = vsel %vm76_vm0, 1.0, %v1308_v39  ;;  %v1244_v39 = vld [vmem:[%s1926_s5 + $0x7c] sm:$0xf]  ;;  %v1261_v25 = vld [vmem:[%s1926_s5 + $0x100] sm:$0xf0] }
  0x77   :  { %v79_v44 = vpack.c.bf16 %v832_v40, %v832_v40  ;;  %v1061_v40 = vld [vmem:[%s1926_s5 + $0x84] sm:$0xf0] }
  0x78   :  { %v1064_v42 = vor.u32 %v1244_v39, %v1061_v40  ;;  %v1133_v40 = vld [vmem:[%s1926_s5 + $0x114] sm:$0xf0] }
  0x79   :  { %849 = vmatmul.msk.bf16.vlgmr.msra.gmra.mxu0 %vm104_vm1, %v79_v44  ;;  %850 = vmatmul.msk.bf16.vlgmr.msra.gmra.mxu2 %vm104_vm1, %v79_v44  ;;  %v1233_v44 = vld [vmem:[%s1926_s5 + $0x20] sm:$0xf0] }
  0x7a   :  { %369 = vmatpush.bf16.msra.mxu0 %v978_v41  ;;  %388 = vmatpush.bf16.msra.mxu2 %v994_v43  ;;  %v1156_v41 = vor.u32 %v1269_v38, %v1155_v36  ;;  %v1011_v43 = vld [vmem:[%s1926_s5 + $0x18] sm:$0xf]  ;;  %v1229_v36 = vld [vmem:[%s1926_s5 + $0x4] sm:$0xf]  ;;  %v1262_v38 = vld [vmem:[%s1926_s5 + $0x10c] sm:$0xf] }
  0x7b   :  { %v1012_v46 = vor.u32 %v1233_v44, %v1011_v43  ;;  %v1004_v39 = vor.u32 %v1229_v36, %v1001_v37  ;;  %v1136_v44 = vor.u32 %v1262_v38, %v1133_v40 }
  0x7d   :  { %741 = vmatpush.bf16.msrb.mxu3 %v1012_v46  ;;  %v1187_v46 = vld [vmem:[%s1926_s5 + $0x170] sm:$0xf] }
  0x7e   :  { %370 = vmatpush.bf16.msra.mxu0 %v970_v51  ;;  %389 = vmatpush.bf16.msra.mxu2 %v986_v52  ;;  %v1052_v51 = vor.u32 %v1241_v48, %v1049_v49  ;;  %v1274_v52 = vld [vmem:[%s1926_s5 + $0x16c] sm:$0xf]  ;;  %v1188_v49 = vor.u32 %v1276_v47, %v1187_v46 }
  0x7f   :  { %v1184_v55 = vor.u32 %v1274_v52, %v1181_v53  ;;  %v1043_v52 = vld [vmem:[%s1926_s5 + $0x50] sm:$0xf] }
  0x81   :  { %742 = vmatpush.bf16.msrb.mxu3 %v1000_v59  ;;  %v1256_v59 = vld [vmem:[%s1926_s5 + $0xdc] sm:$0xf] }
  0x82   :  { %371 = vmatpush.bf16.msra.mxu0 %v962_v60  ;;  %v1263_v60 = vld [vmem:[%s1926_s5 + $0x110] sm:$0xf0] }
  0x83   :  { %v1132_v63 = vor.u32 %v1263_v60, %v1131_v58  ;;  %v1109_v60 = vld [vmem:[%s1926_s5 + $0xe4] sm:$0xf0] }
  0x86   :  { %372 = vmatpush.bf16.msra.mxu0 %v954_v0  ;;  %v1040_v0 = vor.u32 %v1238_v61, %v1037_v62  ;;  %v1031_v61 = vld [vmem:[%s1926_s5 + $0x38] sm:$0xf] }
  0x89   :  { %325 = vmatmul.bf16.vlgmr.msrb.gmra.mxu2 %v1512_v17  ;;  %995 = vmatmul.msk.bf16.vlgmr.msrb.gmra.mxu0 %vm104_vm1, %v33_v4  ;;  %v1179_v17 = vld [vmem:[%s1926_s5 + $0x168] sm:$0xf] }
  0x8a   :  { %373 = vmatpush.bf16.msra.mxu0 %v946_v5  ;;  %v1180_v22 = vor.u32 %v1275_v19, %v1179_v17  ;;  %761 = vmatpush.bf16.msrb.mxu2 %v1088_v23  ;;  %v1252_v5 = vld [vmem:[%s1926_s5 + $0xb8] sm:$0xf0]  ;;  %v1080_v19 = vor.u32 %v1249_v16, %v1079_v15  ;;  %v1007_v15 = vld [vmem:[%s1926_s5 + $0x8] sm:$0xf]  ;;  %v1231_v16 = vld [vmem:[%s1926_s5 + $0x10] sm:$0xf0] }
  0x8b   :  { %v1092_v6 = vor.u32 %v1252_v5, %v1091_v3  ;;  %v1232_v23 = vld [vmem:[%s1926_s5 + $0x1c] sm:$0xf] }
  0x8c   :  { %748 = vmatpush.bf16.msrb.mxu1 %v1180_v22  ;;  %v1108_v22 = vor.u32 %v1257_v21, %v1107_v20  ;;  %v1016_v26 = vor.u32 %v1232_v23, %v1013_v24  ;;  %v1008_v20 = vor.u32 %v1231_v16, %v1007_v15  ;;  %v1264_v21 = vld [vmem:[%s1926_s5 + $0x118] sm:$0xf0]  ;;  %v1127_v24 = vld [vmem:[%s1926_s5 + $0xf8] sm:$0xf] }
  0x8d   :  { %787 = vmatpush.bf16.msra.mxu3 %v1092_v6  ;;  %v1253_v6 = vld [vmem:[%s1926_s5 + $0xc4] sm:$0xf] }
  0x8e   :  { %374 = vmatpush.bf16.msra.mxu0 %v938_v8  ;;  %762 = vmatpush.bf16.msrb.mxu2 %v1076_v33  ;;  %v1260_v8 = vld [vmem:[%s1926_s5 + $0xf8] sm:$0xf0]  ;;  %v1095_v33 = vld [vmem:[%s1926_s5 + $0xc0] sm:$0xf] }
  0x8f   :  { %v1120_v9 = vor.u32 %v1260_v8, %v1119_v7  ;;  %v1096_v35 = vor.u32 %v1254_v34, %v1095_v33  ;;  %v1097_v7 = vld [vmem:[%s1926_s5 + $0xcc] sm:$0xf0]  ;;  %v1019_v8 = vld [vmem:[%s1926_s5 + $0x20] sm:$0xf]  ;;  %v1103_v34 = vld [vmem:[%s1926_s5 + $0xc8] sm:$0xf] }
  0x90   :  { %749 = vmatpush.bf16.msrb.mxu1 %v1168_v32  ;;  %v1068_v32 = vor.u32 %v1246_v30, %v1067_v28  ;;  %v1258_v28 = vld [vmem:[%s1926_s5 + $0xe8] sm:$0xf0]  ;;  %v395_v30 = vld [vmem:[%s1925_s4] sm:$0x3] }
  0x91   :  { %788 = vmatpush.bf16.msra.mxu3 %v1080_v19  ;;  %v397_v38 = vperm.slane %v395_v30, 0 }
  0x92   :  { %375 = vmatpush.bf16.msra.mxu0 %v930_v11  ;;  %763 = vmatpush.bf16.msrb.mxu2 %v1064_v42  ;;  %v1025_v11 = vld [vmem:[%s1926_s5 + $0x3c] sm:$0xf0]  ;;  %v1243_v42 = vld [vmem:[%s1926_s5 + $0x70] sm:$0xf0] }
  0x93   :  { %v1028_v13 = vor.u32 %v1235_v10, %v1025_v11  ;;  %v1234_v10 = vld [vmem:[%s1926_s5 + $0x28] sm:$0xf0]  ;;  %v1151_v11 = vld [vmem:[%s1926_s5 + $0x128] sm:$0xf] }
  0x94   :  { %750 = vmatpush.bf16.msrb.mxu1 %v1156_v41  ;;  %v1055_v41 = vld [vmem:[%s1926_s5 + $0x68] sm:$0xf] }
  0x95   :  { %789 = vmatpush.bf16.msra.mxu3 %v1068_v32  ;;  %v1056_v45 = vor.u32 %v1243_v42, %v1055_v41  ;;  %v1116_v32 = vor.u32 %v1258_v28, %v1115_v27 }
  0x96   :  { %376 = vmatpush.bf16.msra.mxu0 %v922_v14  ;;  %764 = vmatpush.bf16.msrb.mxu2 %v1052_v51  ;;  %v1157_v14 = vld [vmem:[%s1926_s5 + $0x144] sm:$0xf0]  ;;  %v1121_v51 = vld [vmem:[%s1926_s5 + $0xfc] sm:$0xf0] }
  0x97   :  { %v1160_v18 = vor.u32 %v1268_v12, %v1157_v14  ;;  %v1267_v12 = vld [vmem:[%s1926_s5 + $0x130] sm:$0xf0] }
  0x98   :  { %751 = vmatpush.bf16.msrb.mxu1 %v1144_v50  ;;  %v1259_v50 = vld [vmem:[%s1926_s5 + $0xf4] sm:$0xf]  ;;  %v1152_v14 = vor.u32 %v1267_v12, %v1151_v11 }
  0x99   :  { %377 = vmatmul.bf16.vlgmr.msra.gmra.mxu0 %v1542_v31  ;;  %996 = vmatmul.msk.bf16.vlgmr.msra.gmra.mxu2 %vm104_vm1, %v33_v4  ;;  %v1172_v4 = vor.u32 %v1271_v1, %v1169_v2  ;;  %v1124_v53 = vor.u32 %v1259_v50, %v1121_v51  ;;  %v1163_v1 = vld [vmem:[%s1926_s5 + $0x140] sm:$0xf]  ;;  %v1270_v2 = vld [vmem:[%s1926_s5 + $0x148] sm:$0xf0] }
  0x9a   :  { %774 = vmatpush.bf16.msrb.mxu0 %v1184_v55  ;;  %765 = vmatpush.bf16.msrb.mxu2 %v1040_v0  ;;  %v1175_v55 = vld [vmem:[%s1926_s5 + $0x158] sm:$0xf]  ;;  %v1237_v0 = vld [vmem:[%s1926_s5 + $0x40] sm:$0xf0] }
  0x9b   :  { %790 = vmatpush.bf16.msra.mxu3 %v1056_v45  ;;  %v1176_v58 = vor.u32 %v1273_v56, %v1175_v55  ;;  %v1032_v3 = vor.u32 %v1237_v0, %v1031_v61  ;;  %v471_v55 = vld [vmem:[%s1927_s6] sm:$0x7]  ;;  %s821_s6 = sshll.u32 %s1309_s23, 4  ;;  %s822_s6 = int_to_ptr.vmem [resolvable:$true] %s821_s6 }
  0x9c   :  { %752 = vmatpush.bf16.msrb.mxu1 %v1132_v63  ;;  %v1112_v63 = vor.u32 %v1256_v59, %v1109_v60 }
  0x9e   :  { %775 = vmatpush.bf16.msrb.mxu0 %v1172_v4  ;;  %766 = vmatpush.bf16.msrb.mxu2 %v1028_v13  ;;  %v1164_v4 = vor.u32 %v1270_v2, %v1163_v1  ;;  %v1020_v13 = vor.u32 %v1234_v10, %v1019_v8 }
  0xa0   :  { %753 = vmatpush.bf16.msrb.mxu1 %v1120_v9  ;;  %v1100_v9 = vor.u32 %v1253_v6, %v1097_v7  ;;  %v475_v6 = vperm.slane %v471_v55, 2 }
  0xa2   :  { %776 = vmatpush.bf16.msrb.mxu0 %v1160_v18  ;;  %767 = vmatpush.bf16.msrb.mxu2 %v1016_v26  ;;  %v1139_v18 = vld [vmem:[%s1926_s5 + $0x110] sm:$0xf]  ;;  %v1128_v26 = vor.u32 %v1261_v25, %v1127_v24 }
  0xa3   :  { %v1668_v31 = vpop.f32.mrf.mxu1 }
  0xa4   :  { %754 = vmatpush.bf16.msrb.mxu1 %v1108_v22  ;;  %v1140_v22 = vor.u32 %v1264_v21, %v1139_v18 }
  0xa6   :  { %777 = vmatpush.bf16.msrb.mxu0 %v1148_v29  ;;  %768 = vmatpush.bf16.msrb.mxu2 %v1004_v39 }
  0xa8   :  { %755 = vmatpush.bf16.msrb.mxu1 %v1096_v35  ;;  %v1255_v35 = vld [vmem:[%s1926_s5 + $0xd0] sm:$0xf0] }
  0xa9   :  { %v1104_v39 = vor.u32 %v1255_v35, %v1103_v34 }
  0xaa   :  { %778 = vmatpush.bf16.msrb.mxu0 %v1136_v44 }
  0xab   :  { %v367_v54 = vpop.f32.mrf.mxu1 }
  0xac   :  { %800 = vmatpush.bf16.msra.mxu1 %v1188_v49  ;;  %v1240_v54 = vld [vmem:[%s1926_s5 + $0x58] sm:$0xf0] }
  0xad   :  { %v1766_v17 = vpop.f32.mrf.mxu3  ;;  %v1044_v57 = vor.u32 %v1240_v54, %v1043_v52 }
  0xae   :  { %779 = vmatpush.bf16.msrb.mxu0 %v1124_v53 }
  0xaf   :  { %791 = vmatpush.bf16.msra.mxu3 %v1044_v57  ;;  %v473_v57 = vperm.slane %v471_v55, 0 }
  0xb0   :  { %801 = vmatpush.bf16.msra.mxu1 %v1176_v58  ;;  %v474_v58 = vperm.slane %v471_v55, 1 }
  0xb2   :  { %780 = vmatpush.bf16.msrb.mxu0 %v1112_v63 }
  0xb3   :  { %792 = vmatpush.bf16.msra.mxu3 %v1032_v3 }
  0xb4   :  { %802 = vmatpush.bf16.msra.mxu1 %v1164_v4 }
  0xb5   :  { %v341_v43 = vpop.f32.mrf.mxu3 }
  0xb6   :  { %781 = vmatpush.bf16.msrb.mxu0 %v1100_v9 }
  0xb7   :  { %793 = vmatpush.bf16.msra.mxu3 %v1020_v13 }
  0xb8   :  { %803 = vmatpush.bf16.msra.mxu1 %v1152_v14 }
  0xbb   :  { %794 = vmatpush.bf16.msra.mxu3 %v1008_v20 }
  0xbc   :  { %804 = vmatpush.bf16.msra.mxu1 %v1140_v22 }
  0xc0   :  { %805 = vmatpush.bf16.msra.mxu1 %v1128_v26 }
  0xc4   :  { %806 = vmatpush.bf16.msra.mxu1 %v1116_v32 }
  0xc8   :  { %807 = vmatpush.bf16.msra.mxu1 %v1104_v39 }
  0xf6   :  { %v1822_v48 = vpop.f32.mrf.mxu0 }
  0xfc   :  { %v130_v62 = vpop.f32.mrf.mxu2 }
  0xfd   :  { %v366_v46 = vadd.f32 %v1668_v31, %v130_v62 }
  0xfe   :  { %v119_v5 = vpop.f32.mrf.mxu0 }
 0x104   :  { %v132_v19 = vpop.f32.mrf.mxu2 }
 0x106   :  { %v352_v23 = vpop.f32.mrf.mxu0 }
 0x10c   :  { %v326_v29 = vpop.f32.mrf.mxu2 }
 0x10d   :  { %v327_v33 = vadd.f32 %v326_v29, %v1822_v48  ;;  %v398_v48 = vperm.slane %v395_v30, 1 }
 0x10e   :  { %v354_v36 = vpop.f32.mrf.mxu0 }
 0x10f   :  { %v340_v37 = vadd.f32 %v1766_v17, %v327_v33 }
 0x111   :  { %v353_v40 = vadd.f32 %v352_v23, %v340_v37 }
 0x113   :  { %v401_v41 = vadd.f32 %v397_v38, %v353_v40 }
 0x114   :  { %v328_v42 = vpop.f32.mrf.mxu2 }
 0x115   :  { %v403_v43 = vmax.f32 %v401_v41, 0.0 }
 0x116   :  { %v378_v44 = vpop.f32.mrf.mxu0 }
 0x117   :  { %v405_v45 = vpack.c.bf16 %v403_v43, %v403_v43  ;;  %v379_v47 = vadd.f32 %v378_v44, %v366_v46 }
 0x119   :  { %743 = vmatmul.bf16.vlgmr.msrb.gmra.mxu3 %v405_v45  ;;  %769 = vmatmul.bf16.vlgmr.msrb.gmra.mxu2 %v405_v45 }
 0x11c   :  { %v391_v49 = vpop.f32.mrf.mxu2 }
 0x11d   :  { %v392_v50 = vadd.f32 %v391_v49, %v379_v47 }
 0x11e   :  { %v380_v51 = vpop.f32.mrf.mxu0 }
 0x11f   :  { %v402_v17 = vadd.f32 %v398_v48, %v392_v50 }
 0x121   :  { %v404_v52 = vmax.f32 %v402_v17, 0.0 }
 0x123   :  { %v406_v53 = vpack.c.bf16 %v404_v52, %v404_v52 }
 0x124   :  { %v393_v54 = vpop.f32.mrf.mxu2 }
 0x125   :  { %756 = vmatmul.bf16.vlgmr.msrb.gmra.mxu1 %v406_v53  ;;  %782 = vmatmul.bf16.vlgmr.msrb.gmra.mxu0 %v406_v53 }
 0x129   :  { %795 = vmatmul.bf16.vlgmr.msra.gmra.mxu3 %v405_v45 }
 0x135   :  { %808 = vmatmul.bf16.vlgmr.msra.gmra.mxu1 %v406_v53 }
 0x19c   :  { %v744_v31 = vpop.f32.mrf.mxu3  ;;  %v770_v56 = vpop.f32.mrf.mxu2 }
 0x19d   :  { %v745_v59 = vadd.f32 %v744_v31, %v473_v57  ;;  %v771_v60 = vadd.f32 %v770_v56, %v474_v58 }
 0x1a2   :  { %v757_v61 = vpop.f32.mrf.mxu1  ;;  %v783_v62 = vpop.f32.mrf.mxu0 }
 0x1a3   :  { %v758_v63 = vadd.f32 %v757_v61, %v745_v59  ;;  %v784_v0 = vadd.f32 %v783_v62, %v771_v60 }
 0x1a4   :  { %v746_v1 = vpop.f32.mrf.mxu3  ;;  %v772_v2 = vpop.f32.mrf.mxu2 }
 0x1a5   :  { %813 = vst [vmem:[#allocation2] sm:$0xff] %v758_v63 }
 0x1a6   :  { %814 = vst [vmem:[#allocation2 + $0x8] sm:$0xff] %v784_v0 }
 0x1aa   :  { %v759_v3 = vpop.f32.mrf.mxu1  ;;  %v785_v4 = vpop.f32.mrf.mxu0 }
 0x1ac   :  { %v796_v5 = vpop.f32.mrf.mxu3 }
 0x1ad   :  { %v797_v7 = vadd.f32 %v796_v5, %v475_v6 }
 0x1b2   :  { %v809_v8 = vpop.f32.mrf.mxu1 }
 0x1b3   :  { %v810_v9 = vadd.f32 %v809_v8, %v797_v7 }
 0x1b4   :  { %v798_v10 = vpop.f32.mrf.mxu3 }
 0x1b5   :  { %815 = vst.msk [vmem:[#allocation2 + $0x10] sm:$0xff] %vm104_vm1, %v810_v9 }
 0x1b6   :  { %826 = dma.vmem_to_hbm [thread:$0]  %s822_s6, 384, %s824_s26, [#allocation3]  }
 0x1ba   :  { %v811_v11 = vpop.f32.mrf.mxu1 }
 0x1bb   :  { %1305 = dma.done.wait [#allocation3], 384  }
 0x1bc   :  { %1306 = vsyncadd [#allocation3], 4294966912 }
 0x1bd   :  { %831 = vsyncpa [#allocation3], 1 }

</bundles_post_ra>
